<compile_context>
chip_gen: v6e
topology: v6e:2x2x1
jax: 0.10.0
libtpu: 0.0.40
codegen_flags: <defaults>
</compile_context>

<pallas_src>
import math

import jax
import jax.numpy as jnp
from jax import lax
from jax.experimental import pallas as pl
from jax.experimental.pallas import tpu as pltpu

LANE = 128      # vreg lane width
SUBLANE = 8     # f32 sublane width
OUT_ROWS = 8    # sublane-padded output rows: q1 -> row 0, q2 -> row 1


def _round_up(x, m):
    return ((x + m - 1) // m) * m


def _cdiv(a, b):
    return -(-a // b)


# ---------------------------------------------------------------------------
# Kernel
# ---------------------------------------------------------------------------
def qnetwork_kernel(s_ref, a_ref, w1s_ref, w1a_ref, b14_ref, w25_ref, b25_ref,
                    woT_ref, bo_ref, out_ref):
    # fused layer 1 for both critics, split over (state | action) inputs:
    #   h1 = relu(state @ w1s + action @ w1a + b14)        [tb, 2hp]
    s = s_ref[...].astype(jnp.bfloat16)
    a = a_ref[...].astype(jnp.bfloat16)
    h1 = (jnp.dot(s, w1s_ref[...], preferred_element_type=jnp.float32)
          + jnp.dot(a, w1a_ref[...], preferred_element_type=jnp.float32)
          + b14_ref[...])
    h1 = jnp.maximum(h1, 0.0)

    # fused layer 2: one block-diagonal [2hp, 2hp] dot (q1 block | q2 block)
    h2 = jnp.maximum(
        jnp.dot(h1.astype(jnp.bfloat16), w25_ref[...],
                preferred_element_type=jnp.float32) + b25_ref[...],
        0.0)

    # fused heads, batch-on-lanes: [8, 2hp] contracted with h2 [tb, 2hp] on the
    # hidden dim (A @ B^T / QK^T pattern) -> [8, tb]; q1 in row 0, q2 in row 1.
    qrows = lax.dot_general(
        woT_ref[...], h2.astype(jnp.bfloat16),
        dimension_numbers=(((1,), (1,)), ((), ())),
        preferred_element_type=jnp.float32)
    out_ref[...] = qrows + bo_ref[...]


# ---------------------------------------------------------------------------
# Parameter handling
# ---------------------------------------------------------------------------
def xavier_uniform(key, fan_in, fan_out):
    # matches torch.nn.init.xavier_uniform_ with gain=1 (stored transposed [in, out])
    limit = math.sqrt(6.0 / (fan_in + fan_out))
    return jax.random.uniform(key, (fan_in, fan_out), jnp.float32, -limit, limit)


def init_params(key, num_inputs, num_actions, hidden_dim):
    d = num_inputs + num_actions
    ks = jax.random.split(key, 6)
    z = lambda n: jnp.zeros((1, n), jnp.float32)
    return {
        "w1": xavier_uniform(ks[0], d, hidden_dim),           "b1": z(hidden_dim),
        "w2": xavier_uniform(ks[1], hidden_dim, hidden_dim),  "b2": z(hidden_dim),
        "w3": xavier_uniform(ks[2], hidden_dim, 1),           "b3": z(1),
        "w4": xavier_uniform(ks[3], d, hidden_dim),           "b4": z(hidden_dim),
        "w5": xavier_uniform(ks[4], hidden_dim, hidden_dim),  "b5": z(hidden_dim),
        "w6": xavier_uniform(ks[5], hidden_dim, 1),           "b6": z(1),
    }


def pack_params(raw, num_inputs, num_actions, hidden_dim):
    """Fuse/pad parameters. hp = round_up(hidden, 64) so 2*hp is lane-aligned."""
    hp = _round_up(hidden_dim, 64)
    two_hp = 2 * hp
    f32 = jnp.float32

    def pad2(w, r, c):
        return jnp.zeros((r, c), f32).at[:w.shape[0], :w.shape[1]].set(w)

    # fused layer 1, split row-wise into state / action halves (no concat slab in HBM)
    d = num_inputs + num_actions
    w1 = jnp.concatenate([pad2(raw["w1"], d, hp), pad2(raw["w4"], d, hp)], axis=1)
    w1s, w1a = w1[:num_inputs], w1[num_inputs:]
    b14 = jnp.concatenate([pad2(raw["b1"], 1, hp), pad2(raw["b4"], 1, hp)], axis=1)

    # fused layer 2: block-diagonal [2hp, 2hp] (w2 top-left, w5 bottom-right)
    w25 = jnp.zeros((two_hp, two_hp), f32)
    w25 = w25.at[:hidden_dim, :hidden_dim].set(raw["w2"])
    w25 = w25.at[hp:hp + hidden_dim, hp:hp + hidden_dim].set(raw["w5"])
    b25 = jnp.concatenate([pad2(raw["b2"], 1, hp), pad2(raw["b5"], 1, hp)], axis=1)

    # fused heads, stored transposed: row 0 reads the q1 half of h2, row 1 the q2 half
    woT = jnp.zeros((OUT_ROWS, two_hp), f32)
    woT = woT.at[0, :hidden_dim].set(raw["w3"][:, 0])
    woT = woT.at[1, hp:hp + hidden_dim].set(raw["w6"][:, 0])
    bo = (jnp.zeros((OUT_ROWS, 1), f32)
          .at[0, 0].set(raw["b3"][0, 0])
          .at[1, 0].set(raw["b6"][0, 0]))

    bf = jnp.bfloat16
    return {
        "w1s": w1s.astype(bf), "w1a": w1a.astype(bf), "b14": b14,
        "w25": w25.astype(bf), "b25": b25,
        "woT": woT.astype(bf), "bo": bo,
    }


# ---------------------------------------------------------------------------
# Wrapper
# ---------------------------------------------------------------------------
def qnetwork_forward(state, action, kparams, *, batch_tile=1024, min_batch_blocks=2):
    """state: [B, num_inputs], action: [B, num_actions]. Returns (q1, q2) [B, 1] f32."""
    state = state.astype(jnp.float32)
    action = action.astype(jnp.float32)
    B, ni = state.shape
    na = action.shape[1]
    two_hp = kparams["w1s"].shape[1]

    # Tile selection: as few blocks as possible given batch_tile, but >= 2 blocks
    # when the batch is big enough to feed both v7x TensorCores; tb right-sized to
    # B so padding waste is minimal.  (tb multiple of 128 when nb > 1 keeps the
    # batch-on-lanes output blocks lane-dense.)
    nb = max(1, _cdiv(B, batch_tile))
    if B > LANE:
        nb = max(nb, min_batch_blocks)
    if nb == 1:
        tb = _round_up(B, SUBLANE)
    else:
        tb = _round_up(_cdiv(B, nb), LANE)
        nb = _cdiv(B, tb)
    bp = nb * tb

    if bp != B:
        state_p = jnp.pad(state, ((0, bp - B), (0, 0)))
        action_p = jnp.pad(action, ((0, bp - B), (0, 0)))
    else:
        state_p, action_p = state, action

    resident = lambda arr: pl.BlockSpec(arr.shape, lambda i: (0, 0))
    in_specs = [
        pl.BlockSpec((tb, ni), lambda i: (i, 0)),   # state tiles stream over batch
        pl.BlockSpec((tb, na), lambda i: (i, 0)),   # action tiles stream over batch
        resident(kparams["w1s"]), resident(kparams["w1a"]), resident(kparams["b14"]),
        resident(kparams["w25"]), resident(kparams["b25"]),
        resident(kparams["woT"]), resident(kparams["bo"]),
    ]
    out_specs = pl.BlockSpec((OUT_ROWS, tb), lambda i: (0, i))

    flops = 2 * bp * ((ni + na) * two_hp + two_hp * two_hp + two_hp * OUT_ROWS)
    bytes_accessed = (bp * (ni + na) * 4
                      + sum(int(v.size) * v.dtype.itemsize for v in kparams.values())
                      + OUT_ROWS * bp * 4)

    out = pl.pallas_call(
        qnetwork_kernel,
        out_shape=jax.ShapeDtypeStruct((OUT_ROWS, bp), jnp.float32),
        grid_spec=pltpu.PrefetchScalarGridSpec(
            num_scalar_prefetch=0,
            grid=(nb,),
            in_specs=in_specs,
            out_specs=out_specs,
        ),
        compiler_params=pltpu.CompilerParams(
            dimension_semantics=("parallel",),      # megacore / v7x 2-TC batch split
            vmem_limit_bytes=48 * 1024 * 1024,      # > v5e's 16 MiB default, < v7x physical
        ),
        cost_estimate=pl.CostEstimate(
            flops=flops, transcendentals=0, bytes_accessed=bytes_accessed),
    )(state_p, action_p,
      kparams["w1s"], kparams["w1a"], kparams["b14"],
      kparams["w25"], kparams["b25"],
      kparams["woT"], kparams["bo"])

    q1 = out[0, :B, None]
    q2 = out[1, :B, None]
    return q1, q2


# ---------------------------------------------------------------------------
# Pure-JAX reference (f32, unfused, unpadded)
# ---------------------------------------------------------------------------
def reference_forward(state, action, raw):
    xu = jnp.concatenate([state, action], axis=-1)
    x1 = jnp.maximum(xu @ raw["w1"] + raw["b1"], 0.0)
    x1 = jnp.maximum(x1 @ raw["w2"] + raw["b2"], 0.0)
    q1 = x1 @ raw["w3"] + raw["b3"]
    x2 = jnp.maximum(xu @ raw["w4"] + raw["b4"], 0.0)
    x2 = jnp.maximum(x2 @ raw["w5"] + raw["b5"], 0.0)
    q2 = x2 @ raw["w6"] + raw["b6"]
    return q1, q2


if __name__ == "__main__":
    key = jax.random.PRNGKey(0)
    k_param, k_state, k_action, k_state2, k_action2 = jax.random.split(key, 5)

    num_inputs = 16
    num_actions = 8
    hidden_dim = 32

    raw = init_params(k_param, num_inputs, num_actions, hidden_dim)
    kparams = pack_params(raw, num_inputs, num_actions, hidden_dim)

    # small single-block case
    batch = 8
    state = jax.random.normal(k_state, (batch, num_inputs), jnp.float32)
    action = jax.random.normal(k_action, (batch, num_actions), jnp.float32)
    q1, q2 = qnetwork_forward(state, action, kparams)
    jax.block_until_ready((q1, q2))
    ref_q1, ref_q2 = reference_forward(state, action, raw)
    assert q1.shape == (batch, 1) and q2.shape == (batch, 1)
    # bf16 matmul path -> relaxed tolerance vs the f32 reference
    assert jnp.allclose(q1, ref_q1, atol=5e-2, rtol=5e-2)
    assert jnp.allclose(q2, ref_q2, atol=5e-2, rtol=5e-2)

    # larger, non-multiple batch exercising the multi-block (2 TC) + padded path
    batch2 = 300
    state2 = jax.random.normal(k_state2, (batch2, num_inputs), jnp.float32)
    action2 = jax.random.normal(k_action2, (batch2, num_actions), jnp.float32)
    q1b, q2b = qnetwork_forward(state2, action2, kparams)
    jax.block_until_ready((q1b, q2b))
    ref_q1b, ref_q2b = reference_forward(state2, action2, raw)
    assert q1b.shape == (batch2, 1) and q2b.shape == (batch2, 1)
    assert jnp.allclose(q1b, ref_q1b, atol=5e-2, rtol=5e-2)
    assert jnp.allclose(q2b, ref_q2b, atol=5e-2, rtol=5e-2)

    print("KERNEL_OK")
</pallas_src>

<mosaic_0001>
module attributes {stable_mosaic.version = 11 : i64} {
  func.func @qnetwork_kernel(%arg0: i32, %arg1: memref<8x16xf32, #tpu.memory_space<vmem>>, %arg2: memref<8x8xf32, #tpu.memory_space<vmem>>, %arg3: memref<16x128xbf16, #tpu.memory_space<vmem>>, %arg4: memref<8x128xbf16, #tpu.memory_space<vmem>>, %arg5: memref<1x128xf32, #tpu.memory_space<vmem>>, %arg6: memref<128x128xbf16, #tpu.memory_space<vmem>>, %arg7: memref<1x128xf32, #tpu.memory_space<vmem>>, %arg8: memref<8x128xbf16, #tpu.memory_space<vmem>>, %arg9: memref<8x1xf32, #tpu.memory_space<vmem>>, %arg10: memref<8x8xf32, #tpu.memory_space<vmem>>) attributes {dimension_semantics = [#tpu.dimension_semantics<parallel>], iteration_bounds = array<i64: 1>, scalar_prefetch = 0 : i64, scratch_operands = 0 : i64, tpu.core_type = #tpu.core_type<tc>, window_params = [{transform_indices = @transform_0, window_bounds = array<i64: 8, 16>}, {transform_indices = @transform_1, window_bounds = array<i64: 8, 8>}, {pipeline_mode = #tpu.pipeline_mode<synchronous>, transform_indices = @transform_2, window_bounds = array<i64: 16, 128>}, {pipeline_mode = #tpu.pipeline_mode<synchronous>, transform_indices = @transform_3, window_bounds = array<i64: 8, 128>}, {pipeline_mode = #tpu.pipeline_mode<synchronous>, transform_indices = @transform_4, window_bounds = array<i64: 1, 128>}, {pipeline_mode = #tpu.pipeline_mode<synchronous>, transform_indices = @transform_5, window_bounds = array<i64: 128, 128>}, {pipeline_mode = #tpu.pipeline_mode<synchronous>, transform_indices = @transform_6, window_bounds = array<i64: 1, 128>}, {pipeline_mode = #tpu.pipeline_mode<synchronous>, transform_indices = @transform_7, window_bounds = array<i64: 8, 128>}, {pipeline_mode = #tpu.pipeline_mode<synchronous>, transform_indices = @transform_8, window_bounds = array<i64: 8, 1>}, {transform_indices = @transform_9, window_bounds = array<i64: 8, 8>}]} {
    %c0 = arith.constant 0 : index
    %c0_0 = arith.constant 0 : index
    %0 = vector.load %arg1[%c0, %c0_0] : memref<8x16xf32, #tpu.memory_space<vmem>>, vector<8x16xf32>
    %1 = arith.truncf %0 : vector<8x16xf32> to vector<8x16xbf16>
    %c0_1 = arith.constant 0 : index
    %c0_2 = arith.constant 0 : index
    %2 = vector.load %arg2[%c0_1, %c0_2] : memref<8x8xf32, #tpu.memory_space<vmem>>, vector<8x8xf32>
    %3 = arith.truncf %2 : vector<8x8xf32> to vector<8x8xbf16>
    %c0_3 = arith.constant 0 : index
    %c0_4 = arith.constant 0 : index
    %4 = vector.load %arg3[%c0_3, %c0_4] : memref<16x128xbf16, #tpu.memory_space<vmem>>, vector<16x128xbf16>
    %cst = arith.constant dense<0.000000e+00> : vector<8x128xf32>
    %5 = tpu.matmul %1, %4, %cst {dimension_numbers = #tpu.dot_dimension_numbers<[1], [0], [0], [1], [0, 0, 1, 1], [], []>} : vector<8x16xbf16>, vector<16x128xbf16>, vector<8x128xf32> -> vector<8x128xf32>
    %c0_5 = arith.constant 0 : index
    %c0_6 = arith.constant 0 : index
    %6 = vector.load %arg4[%c0_5, %c0_6] : memref<8x128xbf16, #tpu.memory_space<vmem>>, vector<8x128xbf16>
    %cst_7 = arith.constant dense<0.000000e+00> : vector<8x128xf32>
    %7 = tpu.matmul %3, %6, %cst_7 {dimension_numbers = #tpu.dot_dimension_numbers<[1], [0], [0], [1], [0, 0, 1, 1], [], []>} : vector<8x8xbf16>, vector<8x128xbf16>, vector<8x128xf32> -> vector<8x128xf32>
    %8 = arith.addf %5, %7 : vector<8x128xf32>
    %c0_8 = arith.constant 0 : index
    %c0_9 = arith.constant 0 : index
    %9 = vector.load %arg5[%c0_8, %c0_9] : memref<1x128xf32, #tpu.memory_space<vmem>>, vector<1x128xf32>
    %10 = vector.broadcast %9 : vector<1x128xf32> to vector<8x128xf32>
    %11 = arith.addf %8, %10 : vector<8x128xf32>
    %cst_10 = arith.constant 0.000000e+00 : f32
    %12 = vector.broadcast %cst_10 : f32 to vector<8x128xf32>
    %13 = arith.maximumf %11, %12 : vector<8x128xf32>
    %14 = arith.truncf %13 : vector<8x128xf32> to vector<8x128xbf16>
    %c0_11 = arith.constant 0 : index
    %c0_12 = arith.constant 0 : index
    %15 = vector.load %arg6[%c0_11, %c0_12] : memref<128x128xbf16, #tpu.memory_space<vmem>>, vector<128x128xbf16>
    %cst_13 = arith.constant dense<0.000000e+00> : vector<8x128xf32>
    %16 = tpu.matmul %14, %15, %cst_13 {dimension_numbers = #tpu.dot_dimension_numbers<[1], [0], [0], [1], [0, 0, 1, 1], [], []>} : vector<8x128xbf16>, vector<128x128xbf16>, vector<8x128xf32> -> vector<8x128xf32>
    %c0_14 = arith.constant 0 : index
    %c0_15 = arith.constant 0 : index
    %17 = vector.load %arg7[%c0_14, %c0_15] : memref<1x128xf32, #tpu.memory_space<vmem>>, vector<1x128xf32>
    %18 = vector.broadcast %17 : vector<1x128xf32> to vector<8x128xf32>
    %19 = arith.addf %16, %18 : vector<8x128xf32>
    %cst_16 = arith.constant 0.000000e+00 : f32
    %20 = vector.broadcast %cst_16 : f32 to vector<8x128xf32>
    %21 = arith.maximumf %19, %20 : vector<8x128xf32>
    %c0_17 = arith.constant 0 : index
    %c0_18 = arith.constant 0 : index
    %22 = vector.load %arg8[%c0_17, %c0_18] : memref<8x128xbf16, #tpu.memory_space<vmem>>, vector<8x128xbf16>
    %23 = arith.truncf %21 : vector<8x128xf32> to vector<8x128xbf16>
    %cst_19 = arith.constant dense<0.000000e+00> : vector<8x8xf32>
    %24 = tpu.matmul %22, %23, %cst_19 {dimension_numbers = #tpu.dot_dimension_numbers<[1], [1], [0], [0], [0, 0, 1, 0], [], []>} : vector<8x128xbf16>, vector<8x128xbf16>, vector<8x8xf32> -> vector<8x8xf32>
    %c0_20 = arith.constant 0 : index
    %c0_21 = arith.constant 0 : index
    %25 = vector.load %arg9[%c0_20, %c0_21] : memref<8x1xf32, #tpu.memory_space<vmem>>, vector<8x1xf32>
    %26 = vector.broadcast %25 : vector<8x1xf32> to vector<8x8xf32>
    %27 = arith.addf %24, %26 : vector<8x8xf32>
    %c0_22 = arith.constant 0 : index
    %c0_23 = arith.constant 0 : index
    %28 = vector.load %arg10[%c0_22, %c0_23] : memref<8x8xf32, #tpu.memory_space<vmem>>, vector<8x8xf32>
    tpu.vector_store %arg10[%c0_22, %c0_23], %27 {strides = array<i32>} : memref<8x8xf32, #tpu.memory_space<vmem>>, vector<8x8xf32>,
    return
  }
  func.func @transform_0(%arg0: i32) -> (i32, i32) {
    %c0_i32 = arith.constant 0 : i32
    %c0_i32_0 = arith.constant 0 : i32
    return %arg0, %c0_i32 : i32, i32
  }
  func.func @transform_1(%arg0: i32) -> (i32, i32) {
    %c0_i32 = arith.constant 0 : i32
    %c0_i32_0 = arith.constant 0 : i32
    return %arg0, %c0_i32 : i32, i32
  }
  func.func @transform_2(%arg0: i32) -> (i32, i32) {
    %c0_i32 = arith.constant 0 : i32
    %c0_i32_0 = arith.constant 0 : i32
    %c0_i32_1 = arith.constant 0 : i32
    return %c0_i32, %c0_i32_0 : i32, i32
  }
  func.func @transform_3(%arg0: i32) -> (i32, i32) {
    %c0_i32 = arith.constant 0 : i32
    %c0_i32_0 = arith.constant 0 : i32
    %c0_i32_1 = arith.constant 0 : i32
    return %c0_i32, %c0_i32_0 : i32, i32
  }
  func.func @transform_4(%arg0: i32) -> (i32, i32) {
    %c0_i32 = arith.constant 0 : i32
    %c0_i32_0 = arith.constant 0 : i32
    %c0_i32_1 = arith.constant 0 : i32
    return %c0_i32, %c0_i32_0 : i32, i32
  }
  func.func @transform_5(%arg0: i32) -> (i32, i32) {
    %c0_i32 = arith.constant 0 : i32
    %c0_i32_0 = arith.constant 0 : i32
    %c0_i32_1 = arith.constant 0 : i32
    return %c0_i32, %c0_i32_0 : i32, i32
  }
  func.func @transform_6(%arg0: i32) -> (i32, i32) {
    %c0_i32 = arith.constant 0 : i32
    %c0_i32_0 = arith.constant 0 : i32
    %c0_i32_1 = arith.constant 0 : i32
    return %c0_i32, %c0_i32_0 : i32, i32
  }
  func.func @transform_7(%arg0: i32) -> (i32, i32) {
    %c0_i32 = arith.constant 0 : i32
    %c0_i32_0 = arith.constant 0 : i32
    %c0_i32_1 = arith.constant 0 : i32
    return %c0_i32, %c0_i32_0 : i32, i32
  }
  func.func @transform_8(%arg0: i32) -> (i32, i32) {
    %c0_i32 = arith.constant 0 : i32
    %c0_i32_0 = arith.constant 0 : i32
    %c0_i32_1 = arith.constant 0 : i32
    return %c0_i32, %c0_i32_0 : i32, i32
  }
  func.func @transform_9(%arg0: i32) -> (i32, i32) {
    %c0_i32 = arith.constant 0 : i32
    %c0_i32_0 = arith.constant 0 : i32
    return %c0_i32, %arg0 : i32, i32
  }
}

</mosaic_0001>

<bundles_post_ra>
// kernel: tpu_custom_call.1
= control target key start
LH: loop header
LB: loop body
LE: loop exit
PB: predicated region body
PF: predicated region fallthrough
CT: control target
= control target key end

     0   :  { %14 = vsyncpa [#allocation3], 0  ;;  %s674_s0 = inlined_call_operand.vmem [shape: f32[8,16], index: 0, kind: input, shape index: {}]   ;;  %s675_s1 = inlined_call_operand.hbm [shape: f32[8,8], index: 1, kind: input, shape index: {}]   ;;  %s676_s2 = inlined_call_operand.hbm [shape: bf16[16,128], index: 2, kind: input, shape index: {}]   ;;  %s677_s3 = inlined_call_operand.vmem [shape: bf16[8,128], index: 3, kind: input, shape index: {}]   ;;  %s678_s4 = inlined_call_operand.hbm [shape: f32[1,128], index: 4, kind: input, shape index: {}]   ;;  %s679_s5 = inlined_call_operand.hbm [shape: bf16[128,128], index: 5, kind: input, shape index: {}]   ;;  %s680_s6 = inlined_call_operand.vmem [shape: f32[1,128], index: 6, kind: input, shape index: {}]   ;;  %s681_s7 = inlined_call_operand.vmem [shape: bf16[8,128], index: 7, kind: input, shape index: {}]   ;;  %s682_s8 = inlined_call_operand.vmem [shape: f32[8,1], index: 8, kind: input, shape index: {}]   ;;  %s683_s9 = inlined_call_operand.hbm [shape: f32[8,8], index: 9, kind: output, shape index: {}]  }
   0x1   :  { %15 = vsyncpa [#allocation6], 0 }
   0x2   :  { %16 = vsyncpa [#allocation9], 0 }
   0x3   :  { %17 = vsyncpa [#allocation4], 0  ;;  %s572_s30 = smov [#allocation5]  }
   0x4   :  { %s35_s10 = sshll.u32 %s572_s30, 4  ;;  %s36_s10 = int_to_ptr.vmem [resolvable:$true] %s35_s10 }
   0x5   :  { %s472_s11 = scalar_lea.vmem %s36_s10, 128  ;;  %p477_p1 = scmp.lt.s32.totalorder %s36_s10, %s36_s10 }
   0x6   :  { %p473_p0 = scmp.ne.s32.totalorder %s36_s10, %s472_s11  ;;  %p478_p2 = scmp.lt.s32.totalorder %s472_s11, %s472_s11 }
   0x8   :  { %p479_p3 = por %p478_p2, %p477_p1 }
   0xa   :  { %p480_p4 = pnand %p479_p3, %p473_p0 }
   0xc   :  { %483 = shalt.err (!%p480_p4)
}
   0xd   :  { %s573_s12 = smov 64   ;;  %s574_s13 = smov 4  }
   0xe   :  { %41 = dma.hbm_to_vmem [thread:$0]  %s676_s2, 128, %s36_s10, [#allocation6], %s573_s12, %s573_s12, %s574_s13  }
   0xf   :  { %s575_s16 = smov [#allocation2]   ;;  %s576_s18 = smov [#allocation7]  }
  0x10   :  { %s26_s17 = sshll.u32 %s575_s16, 4  ;;  %s50_s19 = sshll.u32 %s576_s18, 4  ;;  %s27_s17 = int_to_ptr.vmem [resolvable:$true] %s26_s17  ;;  %s51_s19 = int_to_ptr.vmem [resolvable:$true] %s50_s19 }
  0x11   :  { %s492_s20 = scalar_lea.vmem %s27_s17, 128  ;;  %p497_p6 = scmp.lt.s32.totalorder %s27_s17, %s27_s17 }
  0x12   :  { %p493_p5 = scmp.ne.s32.totalorder %s27_s17, %s492_s20  ;;  %p498_p7 = scmp.lt.s32.totalorder %s492_s20, %s492_s20 }
  0x14   :  { %p499_p8 = por %p498_p7, %p497_p6 }
  0x16   :  { %p500_p9 = pnand %p499_p8, %p493_p5 }
  0x18   :  { %503 = shalt.err (!%p500_p9)
}
  0x19   :  { %29 = dma.hbm_to_vmem [thread:$0]  %s675_s1, 128, %s27_s17, [#allocation3]  }
  0x1a   :  { %s512_s23 = scalar_lea.vmem %s51_s19, 16  ;;  %s516_s2 = scalar_lea.vmem %s51_s19, 32 }
  0x1b   :  { %p513_p10 = scmp.ne.s32.totalorder %s51_s19, %s512_s23  ;;  %p517_p11 = scmp.lt.s32.totalorder %s51_s19, %s51_s19 }
  0x1c   :  { %p518_p12 = scmp.lt.s32.totalorder %s516_s2, %s512_s23 }
  0x1e   :  { %p519_p13 = por %p518_p12, %p517_p11 }
  0x20   :  { %p520_p0 = pnand %p519_p13, %p513_p10 }
  0x22   :  { %523 = shalt.err (!%p520_p0)
}
  0x23   :  { %53 = dma.hbm_to_vmem [thread:$0]  %s678_s4, 16, %s51_s19, [#allocation6]  }
  0x24   :  { %s577_s26 = smov [#allocation8]  }
  0x25   :  { %s59_s27 = sshll.u32 %s577_s26, 4  ;;  %s60_s27 = int_to_ptr.vmem [resolvable:$true] %s59_s27 }
  0x26   :  { %s532_s28 = scalar_lea.vmem %s60_s27, 1024  ;;  %p537_p2 = scmp.lt.s32.totalorder %s60_s27, %s60_s27 }
  0x27   :  { %p533_p1 = scmp.ne.s32.totalorder %s60_s27, %s532_s28  ;;  %p538_p3 = scmp.lt.s32.totalorder %s532_s28, %s532_s28 }
  0x29   :  { %p539_p4 = por %p538_p3, %p537_p2 }
  0x2b   :  { %p540_p5 = pnand %p539_p4, %p533_p1 }
  0x2d   :  { %543 = shalt.err (!%p540_p5)
}
  0x2e   :  { %65 = dma.hbm_to_vmem [thread:$0]  %s679_s5, 1024, %s60_s27, [#allocation9], %s573_s12, %s573_s12, %s574_s13  }
  0x2f   :  { %564 = dma.done.wait [#allocation3], 128  }
  0x30   :  { %565 = vsyncadd [#allocation3], 4294967168 }
  0x31   :  { %566 = dma.done.wait [#allocation6], 144  }
  0x32   :  { %567 = vsyncadd [#allocation6], 4294967152 }
  0x33   :  { %568 = dma.done.wait [#allocation9], 1024  }
  0x34   :  { %569 = vsyncadd [#allocation9], 4294966272  ;;  %v578_v0 = vmov 0.0   ;;  %vm579_vm0 = vmmov 0   ;;  %vm96_vm1 = vcmask 1043456   ;;  %v87_v2 = vld [vmem:[#allocation2] sm:$0xff] }
  0x35   :  { %406 = vmatprep.subr.bf16.mxu1 %v578_v0  ;;  %408 = vmatprep.mubr.msk.bf16.mxu1 %vm579_vm0, %v578_v0  ;;  %v91_v1 = vld [vmem:[%s677_s3] sm:$0xf]  ;;  %v88_v4 = vpack.c.bf16 %v87_v2, %v87_v2  ;;  %v455_v5 = vld [vmem:[#allocation5] sm:$0xff]   ;;  %vm92_vm2 = vcmask 64512   ;;  %vm146_vm3 = vcmask 130048   ;;  %v459_v11 = vld [vmem:[#allocation8 + $0x20] sm:$0xff]  }
  0x36   :  { %418 = vmatprep.subr.bf16.mxu0 %v578_v0  ;;  %434 = vmatprep.mubr.msk.bf16.mxu0 %vm579_vm0, %v578_v0  ;;  %v98_v3 = vsel %vm96_vm1, %v91_v1, 0  ;;  %v456_v6 = vld [vmem:[#allocation8 + $0x38] sm:$0xff]   ;;  %v457_v7 = vld [vmem:[#allocation8 + $0x30] sm:$0xff]   ;;  %v458_v9 = vld [vmem:[#allocation8 + $0x28] sm:$0xff]   ;;  %v580_v30 = vmov 0  }
  0x37   :  { %407 = vmatpush3.bf16.msra.mxu1 %v98_v3  ;;  %419 = vmatpush3.bf16.msra.mxu0 %v456_v6  ;;  %v85_v8 = vld [vmem:[%s674_s0] sm:$0xff]  ;;  %v460_v12 = vld [vmem:[#allocation8 + $0x18] sm:$0xff]   ;;  %v463_v15 = vld [vmem:[#allocation8] sm:$0xff]  }
  0x38   :  { %412 = vmatprep.subr.bf16.mxu1 %v578_v0  ;;  %420 = vmatprep.subr.bf16.mxu0 %v578_v0  ;;  %v86_v10 = vpack.c.bf16 %v85_v8, %v85_v8  ;;  %v461_v13 = vld [vmem:[#allocation8 + $0x10] sm:$0xff]   ;;  %v462_v14 = vld [vmem:[#allocation8 + $0x8] sm:$0xff]   ;;  %v381_v21 = vld [vmem:[#allocation7] ss:$0 sm:$0xff] }
  0x39   :  { %v314_v29 = vld [vmem:[%s682_s8] sm:$0xff]  ;;  %454 = vset.pattern.permute.xlu0 %v580_v30  ;;  %s581_s8 = smov [#allocation10]  }
  0x3a   :  { %409 = vmatmul.mubr.msk.bf16.vlgmr.msra.gmra.mxu1 %vm92_vm2, %v88_v4  ;;  %317 = vperm.xlu0 %454, %v314_v29   ;;  %v382_v31 = vld [vmem:[%s680_s6] ss:$0 sm:$0xff]  ;;  %s367_s15 = sshll.u32 %s581_s8, 4  ;;  %s368_s15 = int_to_ptr.vmem [resolvable:$true] %s367_s15 }
  0x3b   :  { %413 = vmatpush3.bf16.msra.mxu1 %v455_v5  ;;  %414 = vmatprep.mubr.msk.bf16.mxu1 %vm579_vm0, %v578_v0  ;;  %v312_v39 = vld [vmem:[%s681_s7] sm:$0xf]  ;;  %s544_s6 = scalar_lea.vmem %s368_s15, 128  ;;  %p549_p7 = scmp.lt.s32.totalorder %s368_s15, %s368_s15 }
  0x3c   :  { %438 = vmatprep.subr.bf16.mxu1 %v578_v0  ;;  %421 = vmatpush3.bf16.msra.mxu0 %v457_v7  ;;  %p545_p6 = scmp.ne.s32.totalorder %s368_s15, %s544_s6  ;;  %p550_p8 = scmp.lt.s32.totalorder %s544_s6, %s544_s6 }
  0x3d   :  { %422 = vmatprep.subr.bf16.mxu0 %v578_v0 }
  0x3e   :  { %p551_p9 = por %p550_p8, %p549_p7 }
  0x40   :  { %423 = vmatpush3.bf16.msra.mxu0 %v458_v9  ;;  %p552_p10 = pnand %p551_p9, %p545_p6 }
  0x41   :  { %424 = vmatprep.subr.bf16.mxu0 %v578_v0 }
  0x42   :  { %415 = vmatmul.mubr.msk.bf16.vlgmr.msra.gmra.mxu1 %vm146_vm3, %v86_v10 }
  0x43   :  { %440 = vmatprep.mubr.msk.bf16.mxu1 %vm579_vm0, %v578_v0 }
  0x44   :  { %425 = vmatpush3.bf16.msra.mxu0 %v459_v11 }
  0x45   :  { %426 = vmatprep.subr.bf16.mxu0 %v578_v0 }
  0x48   :  { %427 = vmatpush3.bf16.msra.mxu0 %v460_v12 }
  0x49   :  { %428 = vmatprep.subr.bf16.mxu0 %v578_v0 }
  0x4c   :  { %429 = vmatpush3.bf16.msra.mxu0 %v461_v13 }
  0x4d   :  { %430 = vmatprep.subr.bf16.mxu0 %v578_v0 }
  0x50   :  { %431 = vmatpush3.bf16.msra.mxu0 %v462_v14 }
  0x51   :  { %432 = vmatprep.subr.bf16.mxu0 %v578_v0 }
  0x54   :  { %433 = vmatpush3.bf16.msra.mxu0 %v463_v15 }
  0xb5   :  { %v318_v40 = vpop.permute.xlu0 %317 }
  0xfa   :  { %v134_v16 = vpop.f32.mrf.mxu1 }
  0xfc   :  { %v410_v17 = vpop.f32.mrf.mxu1 }
  0xfe   :  { %v137_v18 = vpop.f32.mrf.mxu1 }
 0x100   :  { %v411_v19 = vpop.f32.mrf.mxu1 }
 0x102   :  { %v184_v20 = vpop.f32.mrf.mxu1 }
 0x103   :  { %v185_v22 = vadd.f32 %v184_v20, %v134_v16 }
 0x104   :  { %v416_v23 = vpop.f32.mrf.mxu1 }
 0x105   :  { %v197_v24 = vadd.f32 %v381_v21, %v185_v22 }
 0x106   :  { %v187_v25 = vpop.f32.mrf.mxu1 }
 0x107   :  { %v198_v26 = vmax.f32 %v197_v24, 0.0 }
 0x108   :  { %v417_v27 = vpop.f32.mrf.mxu1 }
 0x109   :  { %v199_v28 = vpack.c.bf16 %v198_v26, %v198_v26 }
 0x10b   :  { %435 = vmatmul.mubr.bf16.vlgmr.msra.gmra.mxu0 %v199_v28 }
 0x1cb   :  { %v305_v32 = vpop.f32.mrf.mxu0 }
 0x1cc   :  { %v306_v33 = vadd.f32 %v382_v31, %v305_v32 }
 0x1cd   :  { %v436_v34 = vpop.f32.mrf.mxu0 }
 0x1ce   :  { %v311_v35 = vmax.f32 %v306_v33, 0.0 }
 0x1cf   :  { %v308_v36 = vpop.f32.mrf.mxu0 }
 0x1d0   :  { %v313_v37 = vpack.c.bf16 %v311_v35, %v311_v35 }
 0x1d1   :  { %v437_v38 = vpop.f32.mrf.mxu0 }
 0x1d2   :  { %439 = vmatpush3.bf16.xpose.msra.mxu1 %v313_v37 }
 0x1d9   :  { %441 = vmatmul.mubr.bf16.vlgmr.msra.gmra.mxu1 %v312_v39 }
 0x299   :  { %v354_v41 = vpop.f32.mrf.mxu1 }
 0x29a   :  { %v355_v42 = vadd.f32 %v354_v41, %v318_v40 }
 0x29b   :  { %v442_v43 = vpop.f32.mrf.mxu1 }
 0x29c   :  { %360 = vst.msk [vmem:[#allocation10] sm:$0xff] %vm92_vm2, %v355_v42 }
 0x29d   :  { %v357_v44 = vpop.f32.mrf.mxu1 }
 0x29e   :  { %555 = shalt.err (!%p552_p10)
}
 0x29f   :  { %370 = dma.vmem_to_hbm [thread:$0]  %s368_s15, 128, %s683_s9, [#allocation4]   ;;  %v443_v45 = vpop.f32.mrf.mxu1 }
 0x2a0   :  { %570 = dma.done.wait [#allocation4], 128  }
 0x2a1   :  { %571 = vsyncadd [#allocation4], 4294967168 }
 0x2a2   :  { %374 = vsyncpa [#allocation3], 1 }
 0x2a3   :  { %375 = vsyncpa [#allocation6], 1 }
 0x2a4   :  { %376 = vsyncpa [#allocation9], 1 }
 0x2a5   :  { %377 = vsyncpa [#allocation4], 1 }

</bundles_post_ra>
